<compile_context>
chip_gen: v6e
topology: v6e:2x2x1
jax: 0.10.0
libtpu: 0.0.40
codegen_flags: <defaults>
</compile_context>

<pallas_src>
import functools

import jax
import jax.numpy as jnp
from jax import lax
from jax.experimental import pallas as pl
from jax.experimental.pallas import tpu as pltpu


def _self_attention_kernel(x_ref, w_qkv_ref, w_proj_ref, o_ref, *, n_head):
    """One batch element: fused QKV, per-head attention, output projection.

    x_ref:      (T, C)   bf16   activations for this batch element
    w_qkv_ref:  (C, 3C)  bf16   fused qkv projection (q columns pre-scaled)
    w_proj_ref: (C, C)   bf16   output projection
    o_ref:      (T, C)   f32    output
    """
    T, C = x_ref.shape
    D = C // n_head

    # Single fused QKV projection: N = 3C lane fill on the MXU, f32 accumulate.
    qkv = jnp.dot(x_ref[...], w_qkv_ref[...],
                  preferred_element_type=jnp.float32)          # (T, 3C) f32
    qkv = qkv.astype(jnp.bfloat16)                             # MXU operands

    head_outs = []
    for h in range(n_head):                                    # static unroll
        q = qkv[:, 0 * C + h * D: 0 * C + (h + 1) * D]         # (T, D) bf16
        k = qkv[:, 1 * C + h * D: 1 * C + (h + 1) * D]         # (T, D) bf16
        v = qkv[:, 2 * C + h * D: 2 * C + (h + 1) * D]         # (T, D) bf16

        # q @ k.T without materializing the transpose: contract over D.
        s = lax.dot_general(
            q, k, dimension_numbers=(((1,), (1,)), ((), ())),
            preferred_element_type=jnp.float32)                 # (T, T) f32

        # Softmax in f32, normalization deferred until after p @ v.
        m = jnp.max(s, axis=-1, keepdims=True)
        p = jnp.exp(s - m)                                      # unnormalized, (0, 1]
        denom = jnp.sum(p, axis=-1, keepdims=True)              # (T, 1), >= 1

        o_h = jnp.dot(p.astype(jnp.bfloat16), v,
                      preferred_element_type=jnp.float32)       # (T, D) f32
        o_h = o_h * pl.reciprocal(denom, approx=True)           # T*D mults, EUP
        head_outs.append(o_h.astype(jnp.bfloat16))

    y = jnp.concatenate(head_outs, axis=-1)                     # (T, C) bf16

    # Single K = C output-projection GEMM.
    o_ref[...] = jnp.dot(y, w_proj_ref[...],
                         preferred_element_type=jnp.float32).astype(o_ref.dtype)


def _vmem_limit_bytes(T, C):
    """Shape-derived VMEM limit, clamped to the device's capacity."""
    est = (2 * T * C * 2          # x bf16, double buffered
           + 2 * T * C * 4        # out f32, double buffered
           + 2 * 4 * C * C * 2    # w_qkv + w_proj bf16, double buffered
           + T * 3 * C * 4        # qkv f32
           + T * 3 * C * 2        # qkv bf16
           + 2 * T * T * 4        # scores + probs f32 (one head live at a time)
           + T * C * 2            # concatenated head outputs bf16
           + T * C * 4)           # projection result f32
    est = int(est * 1.5) + (4 << 20)          # headroom for compiler scratch
    try:
        cap = pltpu.get_tpu_info().vmem_capacity_bytes   # 128 MiB v5e/v6e, 64 MiB v7x
    except Exception:
        cap = 64 << 20                                    # conservative fallback
    return int(max(32 << 20, min(est, cap * 3 // 4)))


def self_attention(x, w_attn, w_proj, n_head):
    """x: (B, T, C) f32; w_attn: (C, 3C); w_proj: (C, C). Returns (B, T, C) f32."""
    B, T, C = x.shape
    D = C // n_head
    scale = 1.0 / (D ** 0.5)

    # Host-side layout / precision plumbing:
    #   * fold 1/sqrt(D) into the q columns of the fused qkv weight,
    #   * pre-cast activations and weights to bf16 (halves HBM->VMEM bytes).
    col_scale = jnp.concatenate(
        [jnp.full((C,), scale, dtype=w_attn.dtype),
         jnp.ones((2 * C,), dtype=w_attn.dtype)])
    w_qkv = (w_attn * col_scale).astype(jnp.bfloat16)           # (C, 3C)
    w_p = w_proj.astype(jnp.bfloat16)                           # (C, C)
    x_bf16 = x.astype(jnp.bfloat16)                             # (B, T, C)

    kernel = functools.partial(_self_attention_kernel, n_head=n_head)
    return pl.pallas_call(
        kernel,
        out_shape=jax.ShapeDtypeStruct((B, T, C), x.dtype),
        grid_spec=pltpu.PrefetchScalarGridSpec(
            num_scalar_prefetch=0,
            grid=(B,),
            in_specs=[
                pl.BlockSpec((pl.Squeezed(), T, C), lambda b: (b, 0, 0)),
                pl.BlockSpec((C, 3 * C), lambda b: (0, 0)),
                pl.BlockSpec((C, C), lambda b: (0, 0)),
            ],
            out_specs=pl.BlockSpec((pl.Squeezed(), T, C), lambda b: (b, 0, 0)),
        ),
        compiler_params=pltpu.CompilerParams(
            dimension_semantics=("parallel",),
            vmem_limit_bytes=_vmem_limit_bytes(T, C)),
    )(x_bf16, w_qkv, w_p)


def self_attention_ref(x, w_attn, w_proj, n_head):
    """Pure-JAX f32 reference mirroring the PyTorch forward."""
    B, T, C = x.shape
    D = C // n_head
    qkv = x @ w_attn                                   # (B, T, 3C)
    q, k, v = jnp.split(qkv, 3, axis=-1)

    def heads(t):  # (B, T, C) -> (B, H, T, D)
        return t.reshape(B, T, n_head, D).transpose(0, 2, 1, 3)

    q, k, v = heads(q), heads(k), heads(v)
    s = jnp.einsum("bhqd,bhkd->bhqk", q, k) / (D ** 0.5)
    p = jax.nn.softmax(s, axis=-1)
    y = jnp.einsum("bhqk,bhkd->bhqd", p, v)            # (B, H, T, D)
    y = y.transpose(0, 2, 1, 3).reshape(B, T, C)
    return y @ w_proj


if __name__ == "__main__":
    # Small shapes consistent with the module: d_model=32, n_head=4, seq=8, batch=2.
    B, T, d_model, n_head = 2, 8, 32, 4

    key = jax.random.PRNGKey(0)
    kx, ka, kp = jax.random.split(key, 3)

    x = jax.random.normal(kx, (B, T, d_model), dtype=jnp.float32)

    # PyTorch nn.Linear(d, 3d, bias=False).weight has shape (3C, C); forward does
    # x @ W.T, so we store the pre-transposed (C, 3C) / (C, C) matrices.
    w_attn = jax.random.normal(ka, (d_model, 3 * d_model), dtype=jnp.float32) * 0.02
    w_proj = jax.random.normal(kp, (d_model, d_model), dtype=jnp.float32) * 0.02

    y = self_attention(x, w_attn, w_proj, n_head)
    y = jax.block_until_ready(y)

    y_ref = self_attention_ref(x, w_attn, w_proj, n_head)
    assert y.shape == (B, T, d_model)
    # bf16 MXU inputs + approx reciprocal => slightly looser tolerance than pure f32.
    assert jnp.allclose(y, y_ref, atol=1e-3, rtol=3e-2), "mismatch vs reference"

    print("KERNEL_OK")
</pallas_src>

<mosaic_0001>
module attributes {stable_mosaic.version = 11 : i64} {
  func.func @_self_attention_kernel(%arg0: i32, %arg1: memref<1x8x32xbf16, #tpu.memory_space<vmem>>, %arg2: memref<32x96xbf16, #tpu.memory_space<vmem>>, %arg3: memref<32x32xbf16, #tpu.memory_space<vmem>>, %arg4: memref<1x8x32xf32, #tpu.memory_space<vmem>>) attributes {dimension_semantics = [#tpu.dimension_semantics<parallel>], iteration_bounds = array<i64: 2>, scalar_prefetch = 0 : i64, scratch_operands = 0 : i64, tpu.core_type = #tpu.core_type<tc>, window_params = [{transform_indices = @transform_0, window_bounds = array<i64: 1, 8, 32>}, {pipeline_mode = #tpu.pipeline_mode<synchronous>, transform_indices = @transform_1, window_bounds = array<i64: 32, 96>}, {pipeline_mode = #tpu.pipeline_mode<synchronous>, transform_indices = @transform_2, window_bounds = array<i64: 32, 32>}, {transform_indices = @transform_3, window_bounds = array<i64: 1, 8, 32>}]} {
    %c0 = arith.constant 0 : index
    %c0_0 = arith.constant 0 : index
    %c0_1 = arith.constant 0 : index
    %0 = vector.load %arg1[%c0, %c0_0, %c0_1] : memref<1x8x32xbf16, #tpu.memory_space<vmem>>, vector<1x8x32xbf16>
    %1 = vector.shape_cast %0 : vector<1x8x32xbf16> to vector<8x32xbf16>
    %c0_2 = arith.constant 0 : index
    %c0_3 = arith.constant 0 : index
    %2 = vector.load %arg2[%c0_2, %c0_3] : memref<32x96xbf16, #tpu.memory_space<vmem>>, vector<32x96xbf16>
    %cst = arith.constant dense<0.000000e+00> : vector<8x96xf32>
    %3 = tpu.matmul %1, %2, %cst {dimension_numbers = #tpu.dot_dimension_numbers<[1], [0], [0], [1], [0, 0, 1, 1], [], []>} : vector<8x32xbf16>, vector<32x96xbf16>, vector<8x96xf32> -> vector<8x96xf32>
    %4 = arith.truncf %3 : vector<8x96xf32> to vector<8x96xbf16>
    %5 = vector.extract_strided_slice %4 {offsets = [0, 0], sizes = [8, 8], strides = [1, 1]} : vector<8x96xbf16> to vector<8x8xbf16>
    %6 = vector.extract_strided_slice %4 {offsets = [0, 32], sizes = [8, 8], strides = [1, 1]} : vector<8x96xbf16> to vector<8x8xbf16>
    %7 = vector.extract_strided_slice %4 {offsets = [0, 64], sizes = [8, 8], strides = [1, 1]} : vector<8x96xbf16> to vector<8x8xbf16>
    %cst_4 = arith.constant dense<0.000000e+00> : vector<8x8xf32>
    %8 = tpu.matmul %5, %6, %cst_4 {dimension_numbers = #tpu.dot_dimension_numbers<[1], [1], [0], [0], [0, 0, 1, 0], [], []>} : vector<8x8xbf16>, vector<8x8xbf16>, vector<8x8xf32> -> vector<8x8xf32>
    %cst_5 = arith.constant dense<0xFF800000> : vector<8xf32>
    %9 = vector.multi_reduction <maximumf>, %8, %cst_5 [1] : vector<8x8xf32> to vector<8xf32>
    %10 = vector.shape_cast %9 : vector<8xf32> to vector<8x1xf32>
    %11 = vector.broadcast %10 : vector<8x1xf32> to vector<8x8xf32>
    %12 = arith.subf %8, %11 : vector<8x8xf32>
    %13 = math.exp %12 : vector<8x8xf32>
    %cst_6 = arith.constant dense<0.000000e+00> : vector<8xf32>
    %14 = vector.multi_reduction <add>, %13, %cst_6 [1] : vector<8x8xf32> to vector<8xf32>
    %15 = vector.shape_cast %14 : vector<8xf32> to vector<8x1xf32>
    %16 = arith.truncf %13 : vector<8x8xf32> to vector<8x8xbf16>
    %cst_7 = arith.constant dense<0.000000e+00> : vector<8x8xf32>
    %17 = tpu.matmul %16, %7, %cst_7 {dimension_numbers = #tpu.dot_dimension_numbers<[1], [0], [0], [1], [0, 0, 1, 1], [], []>} : vector<8x8xbf16>, vector<8x8xbf16>, vector<8x8xf32> -> vector<8x8xf32>
    %18 = tpu.reciprocal %15 {approx = true} : vector<8x1xf32> -> vector<8x1xf32>
    %19 = vector.broadcast %18 : vector<8x1xf32> to vector<8x8xf32>
    %20 = arith.mulf %17, %19 : vector<8x8xf32>
    %21 = arith.truncf %20 : vector<8x8xf32> to vector<8x8xbf16>
    %22 = vector.extract_strided_slice %4 {offsets = [0, 8], sizes = [8, 8], strides = [1, 1]} : vector<8x96xbf16> to vector<8x8xbf16>
    %23 = vector.extract_strided_slice %4 {offsets = [0, 40], sizes = [8, 8], strides = [1, 1]} : vector<8x96xbf16> to vector<8x8xbf16>
    %24 = vector.extract_strided_slice %4 {offsets = [0, 72], sizes = [8, 8], strides = [1, 1]} : vector<8x96xbf16> to vector<8x8xbf16>
    %cst_8 = arith.constant dense<0.000000e+00> : vector<8x8xf32>
    %25 = tpu.matmul %22, %23, %cst_8 {dimension_numbers = #tpu.dot_dimension_numbers<[1], [1], [0], [0], [0, 0, 1, 0], [], []>} : vector<8x8xbf16>, vector<8x8xbf16>, vector<8x8xf32> -> vector<8x8xf32>
    %cst_9 = arith.constant dense<0xFF800000> : vector<8xf32>
    %26 = vector.multi_reduction <maximumf>, %25, %cst_9 [1] : vector<8x8xf32> to vector<8xf32>
    %27 = vector.shape_cast %26 : vector<8xf32> to vector<8x1xf32>
    %28 = vector.broadcast %27 : vector<8x1xf32> to vector<8x8xf32>
    %29 = arith.subf %25, %28 : vector<8x8xf32>
    %30 = math.exp %29 : vector<8x8xf32>
    %cst_10 = arith.constant dense<0.000000e+00> : vector<8xf32>
    %31 = vector.multi_reduction <add>, %30, %cst_10 [1] : vector<8x8xf32> to vector<8xf32>
    %32 = vector.shape_cast %31 : vector<8xf32> to vector<8x1xf32>
    %33 = arith.truncf %30 : vector<8x8xf32> to vector<8x8xbf16>
    %cst_11 = arith.constant dense<0.000000e+00> : vector<8x8xf32>
    %34 = tpu.matmul %33, %24, %cst_11 {dimension_numbers = #tpu.dot_dimension_numbers<[1], [0], [0], [1], [0, 0, 1, 1], [], []>} : vector<8x8xbf16>, vector<8x8xbf16>, vector<8x8xf32> -> vector<8x8xf32>
    %35 = tpu.reciprocal %32 {approx = true} : vector<8x1xf32> -> vector<8x1xf32>
    %36 = vector.broadcast %35 : vector<8x1xf32> to vector<8x8xf32>
    %37 = arith.mulf %34, %36 : vector<8x8xf32>
    %38 = arith.truncf %37 : vector<8x8xf32> to vector<8x8xbf16>
    %39 = vector.extract_strided_slice %4 {offsets = [0, 16], sizes = [8, 8], strides = [1, 1]} : vector<8x96xbf16> to vector<8x8xbf16>
    %40 = vector.extract_strided_slice %4 {offsets = [0, 48], sizes = [8, 8], strides = [1, 1]} : vector<8x96xbf16> to vector<8x8xbf16>
    %41 = vector.extract_strided_slice %4 {offsets = [0, 80], sizes = [8, 8], strides = [1, 1]} : vector<8x96xbf16> to vector<8x8xbf16>
    %cst_12 = arith.constant dense<0.000000e+00> : vector<8x8xf32>
    %42 = tpu.matmul %39, %40, %cst_12 {dimension_numbers = #tpu.dot_dimension_numbers<[1], [1], [0], [0], [0, 0, 1, 0], [], []>} : vector<8x8xbf16>, vector<8x8xbf16>, vector<8x8xf32> -> vector<8x8xf32>
    %cst_13 = arith.constant dense<0xFF800000> : vector<8xf32>
    %43 = vector.multi_reduction <maximumf>, %42, %cst_13 [1] : vector<8x8xf32> to vector<8xf32>
    %44 = vector.shape_cast %43 : vector<8xf32> to vector<8x1xf32>
    %45 = vector.broadcast %44 : vector<8x1xf32> to vector<8x8xf32>
    %46 = arith.subf %42, %45 : vector<8x8xf32>
    %47 = math.exp %46 : vector<8x8xf32>
    %cst_14 = arith.constant dense<0.000000e+00> : vector<8xf32>
    %48 = vector.multi_reduction <add>, %47, %cst_14 [1] : vector<8x8xf32> to vector<8xf32>
    %49 = vector.shape_cast %48 : vector<8xf32> to vector<8x1xf32>
    %50 = arith.truncf %47 : vector<8x8xf32> to vector<8x8xbf16>
    %cst_15 = arith.constant dense<0.000000e+00> : vector<8x8xf32>
    %51 = tpu.matmul %50, %41, %cst_15 {dimension_numbers = #tpu.dot_dimension_numbers<[1], [0], [0], [1], [0, 0, 1, 1], [], []>} : vector<8x8xbf16>, vector<8x8xbf16>, vector<8x8xf32> -> vector<8x8xf32>
    %52 = tpu.reciprocal %49 {approx = true} : vector<8x1xf32> -> vector<8x1xf32>
    %53 = vector.broadcast %52 : vector<8x1xf32> to vector<8x8xf32>
    %54 = arith.mulf %51, %53 : vector<8x8xf32>
    %55 = arith.truncf %54 : vector<8x8xf32> to vector<8x8xbf16>
    %56 = vector.extract_strided_slice %4 {offsets = [0, 24], sizes = [8, 8], strides = [1, 1]} : vector<8x96xbf16> to vector<8x8xbf16>
    %57 = vector.extract_strided_slice %4 {offsets = [0, 56], sizes = [8, 8], strides = [1, 1]} : vector<8x96xbf16> to vector<8x8xbf16>
    %58 = vector.extract_strided_slice %4 {offsets = [0, 88], sizes = [8, 8], strides = [1, 1]} : vector<8x96xbf16> to vector<8x8xbf16>
    %cst_16 = arith.constant dense<0.000000e+00> : vector<8x8xf32>
    %59 = tpu.matmul %56, %57, %cst_16 {dimension_numbers = #tpu.dot_dimension_numbers<[1], [1], [0], [0], [0, 0, 1, 0], [], []>} : vector<8x8xbf16>, vector<8x8xbf16>, vector<8x8xf32> -> vector<8x8xf32>
    %cst_17 = arith.constant dense<0xFF800000> : vector<8xf32>
    %60 = vector.multi_reduction <maximumf>, %59, %cst_17 [1] : vector<8x8xf32> to vector<8xf32>
    %61 = vector.shape_cast %60 : vector<8xf32> to vector<8x1xf32>
    %62 = vector.broadcast %61 : vector<8x1xf32> to vector<8x8xf32>
    %63 = arith.subf %59, %62 : vector<8x8xf32>
    %64 = math.exp %63 : vector<8x8xf32>
    %cst_18 = arith.constant dense<0.000000e+00> : vector<8xf32>
    %65 = vector.multi_reduction <add>, %64, %cst_18 [1] : vector<8x8xf32> to vector<8xf32>
    %66 = vector.shape_cast %65 : vector<8xf32> to vector<8x1xf32>
    %67 = arith.truncf %64 : vector<8x8xf32> to vector<8x8xbf16>
    %cst_19 = arith.constant dense<0.000000e+00> : vector<8x8xf32>
    %68 = tpu.matmul %67, %58, %cst_19 {dimension_numbers = #tpu.dot_dimension_numbers<[1], [0], [0], [1], [0, 0, 1, 1], [], []>} : vector<8x8xbf16>, vector<8x8xbf16>, vector<8x8xf32> -> vector<8x8xf32>
    %69 = tpu.reciprocal %66 {approx = true} : vector<8x1xf32> -> vector<8x1xf32>
    %70 = vector.broadcast %69 : vector<8x1xf32> to vector<8x8xf32>
    %71 = arith.mulf %68, %70 : vector<8x8xf32>
    %72 = arith.truncf %71 : vector<8x8xf32> to vector<8x8xbf16>
    %73 = tpu.concatenate %21, %38, %55, %72 in 1 : vector<8x8xbf16>, vector<8x8xbf16>, vector<8x8xbf16>, vector<8x8xbf16> -> vector<8x32xbf16>
    %c0_20 = arith.constant 0 : index
    %c0_21 = arith.constant 0 : index
    %74 = vector.load %arg3[%c0_20, %c0_21] : memref<32x32xbf16, #tpu.memory_space<vmem>>, vector<32x32xbf16>
    %cst_22 = arith.constant dense<0.000000e+00> : vector<8x32xf32>
    %75 = tpu.matmul %73, %74, %cst_22 {dimension_numbers = #tpu.dot_dimension_numbers<[1], [0], [0], [1], [0, 0, 1, 1], [], []>} : vector<8x32xbf16>, vector<32x32xbf16>, vector<8x32xf32> -> vector<8x32xf32>
    %c0_23 = arith.constant 0 : index
    %c0_24 = arith.constant 0 : index
    %c0_25 = arith.constant 0 : index
    %76 = vector.load %arg4[%c0_23, %c0_24, %c0_25] : memref<1x8x32xf32, #tpu.memory_space<vmem>>, vector<1x8x32xf32>
    %77 = vector.shape_cast %76 : vector<1x8x32xf32> to vector<8x32xf32>
    %78 = vector.shape_cast %75 : vector<8x32xf32> to vector<1x8x32xf32>
    tpu.vector_store %arg4[%c0_23, %c0_24, %c0_25], %78 {strides = array<i32>} : memref<1x8x32xf32, #tpu.memory_space<vmem>>, vector<1x8x32xf32>,
    return
  }
  func.func @transform_0(%arg0: i32) -> (i32, i32, i32) {
    %c0_i32 = arith.constant 0 : i32
    %c0_i32_0 = arith.constant 0 : i32
    %c0_i32_1 = arith.constant 0 : i32
    return %arg0, %c0_i32, %c0_i32_0 : i32, i32, i32
  }
  func.func @transform_1(%arg0: i32) -> (i32, i32) {
    %c0_i32 = arith.constant 0 : i32
    %c0_i32_0 = arith.constant 0 : i32
    %c0_i32_1 = arith.constant 0 : i32
    return %c0_i32, %c0_i32_0 : i32, i32
  }
  func.func @transform_2(%arg0: i32) -> (i32, i32) {
    %c0_i32 = arith.constant 0 : i32
    %c0_i32_0 = arith.constant 0 : i32
    %c0_i32_1 = arith.constant 0 : i32
    return %c0_i32, %c0_i32_0 : i32, i32
  }
  func.func @transform_3(%arg0: i32) -> (i32, i32, i32) {
    %c0_i32 = arith.constant 0 : i32
    %c0_i32_0 = arith.constant 0 : i32
    %c0_i32_1 = arith.constant 0 : i32
    return %arg0, %c0_i32, %c0_i32_0 : i32, i32, i32
  }
}

</mosaic_0001>

<bundles_post_ra>
// kernel: tpu_custom_call.1
= control target key start
LH: loop header
LB: loop body
LE: loop exit
PB: predicated region body
PF: predicated region fallthrough
CT: control target
= control target key end

     0   :  { %8 = vsyncpa [#allocation3], 0  ;;  %s1568_s0 = inlined_call_operand.hbm [shape: bf16[2,8,32], index: 0, kind: input, shape index: {}]   ;;  %s1569_s1 = inlined_call_operand.hbm [shape: bf16[32,96], index: 1, kind: input, shape index: {}]   ;;  %s1570_s2 = inlined_call_operand.hbm [shape: bf16[32,32], index: 2, kind: input, shape index: {}]   ;;  %s1571_s3 = inlined_call_operand.hbm [shape: f32[2,8,32], index: 3, kind: output, shape index: {}]  }
   0x1   :  { %10 = vsyncpa [#allocation3 + $0x1], 0 }
   0x2   :  { %11 = vsyncpa [#allocation6], 0 }
   0x3   :  { %12 = vsyncpa [#allocation4], 0 }
   0x4   :  { %14 = vsyncpa [#allocation4 + $0x1], 0  ;;  %s1316_s12 = smov 0   ;;  %s1318_s13 = smov 0  }
   0x5   :  { %s1320_s14 = smov 0   ;;  %s1322_s15 = smov 0  }
   0x6 LB: > { %s1337_s16 = sadd.s32 4294967295, %s1272_s15   ;;  %s903_s17 = sadd.s32 4294967294, %s1272_s15   ;;  %s1272_s15 = sphi %s1322_s15, %s1593_s15   ;;  %s1268_s14 = sphi %s1320_s14, %s1592_s14   ;;  %s1264_s13 = sphi %s1318_s13, %s1591_s13   ;;  %s1260_s12 = sphi %s1316_s12, %s1590_s12  }
   0x7   : > { %p40_p0 = scmp.ne.s32.totalorder %s1264_s13, %s1260_s12  ;;  %p1572_p1 = scmp.eq.s32.totalorder %s1337_s16, 0 }
   0x8   : > { %p112_p3 = scmp.eq.s32.totalorder %s903_s17, 1  ;;  %p904_p5 = scmp.ge.s32.totalorder %s1272_s15, 1 }
   0x9   : > { %p1346_p4 = por %p1572_p1, %p40_p0  ;;  %p119_p7 = scmp.lt.s32.totalorder %s1272_s15, 3 }
   0xa   : > { %p1351_p6 = por %p112_p3, %p40_p0  ;;  %s1274_s21 = smov [#allocation5]  }
   0xb   : > { %s1576_s18 = scalar_select %p1346_p4, 1, 0 }
   0xc   : > { %s1577_s19 = scalar_select %p1351_p6, 1, 0 }
   0xd   : > { %p1356_p8 = pnand %p904_p5, %p119_p7  ;;  %s131_s22 = sshll.u32 %s1274_s21, 4  ;;  %s132_s22 = int_to_ptr.vmem [resolvable:$true] %s131_s22 }
   0xe   : > { %s1275_s24 = smov [#allocation7]   ;;  %s1135_s26 = scalar_lea.vmem %s132_s22, 256 }
   0xf   : > { %s1578_s20 = scalar_select %p1356_p8, 1, 0 }
  0x10   : > { %p1031_p9 = pneg %p1356_p8  ;;  %s144_s25 = sshll.u32 %s1275_s24, 4  ;;  %s145_s25 = int_to_ptr.vmem [resolvable:$true] %s144_s25 }
  0x11   : > { %p1136_p13 = scmp.ne.s32.totalorder %s132_s22, %s1135_s26  ;;  %p1143_p5 = scmp.lt.s32.totalorder %s132_s22, %s132_s22 }
  0x12   : > { %p1365_p11 = pnand %p1031_p9, %p1572_p1  ;;  %p1144_p7 = scmp.lt.s32.totalorder %s1135_s26, %s1135_s26 }
  0x14   : > { %p1126_p12 = pneg %p1365_p11  ;;  %p1145_p10 = por %p1144_p7, %p1143_p5 }
  0x16   : > { %p1138_p0 = pnand %p1136_p13, %p1126_p12 }
  0x18   : > { %p1139_p3 = pneg %p1138_p0 }
  0x1a   : > { %p1146_p9 = pnand %p1145_p10, %p1139_p3 }
  0x1c   : > { %1149 = shalt.err (!%p1146_p9)
}
  0x1d   : > { %s1276_s27 = smov 64   ;;  %s1277_s28 = smov 4  }
  0x1e   : > { %1034 = dma.hbm_to_vmem [thread:$0]  (!%p1365_p11), %s1569_s1, 256, %s132_s22, [#allocation6], %s1276_s27, %s1276_s27, %s1277_s28  }
  0x1f   : > { %s1161_s4 = scalar_lea.vmem %s145_s25, 256  ;;  %p1169_p2 = scmp.lt.s32.totalorder %s145_s25, %s145_s25 }
  0x20   : > { %p1162_p1 = scmp.ne.s32.totalorder %s145_s25, %s1161_s4  ;;  %p1170_p6 = scmp.lt.s32.totalorder %s1161_s4, %s1161_s4 }
  0x22   : > { %p1164_p13 = pnand %p1162_p1, %p1126_p12  ;;  %p1171_p5 = por %p1170_p6, %p1169_p2 }
  0x24   : > { %p1165_p0 = pneg %p1164_p13 }
  0x26   : > { %p1172_p10 = pnand %p1171_p5, %p1165_p0 }
  0x28   : > { %1175 = shalt.err (!%p1172_p10)
}
  0x29   : > { %1037 = dma.hbm_to_vmem [thread:$0]  (!%p1365_p11), %s1570_s2, 256, %s145_s25, [#allocation6], %s1276_s27, %s1276_s27, %s1277_s28  }
  0x2a   : > { %s1388_s7 = sadd.s32 1, %s1272_s15   ;;  %s27_s8 = sadd.s32 1, %s1268_s14 }
  0x2b   : > { %s24_s9 = ssub.s32 %s1272_s15, %s1388_s7  ;;  %p34_p1 = scmp.ne.s32.totalorder %s1268_s14, %s1264_s13 }
  0x2c   : > { %p25_p2 = scmp.eq.s32.totalorder %s24_s9, 0  ;;  %p35_p6 = scmp.eq.s32.totalorder %s1272_s15, 0 }
  0x2d   : > { %p1580_p12 = scmp.eq.s32.totalorder %s1337_s16, 1  ;;  %p1048_p7 = scmp.lt.s32.totalorder %s1272_s15, 2 }
  0x2e   : > { %s1404_s11 = scalar_select %p25_p2, %s1268_s14, %s27_s8  }
  0x2f   : > { %p1398_p3 = por %p1580_p12, %p34_p1  ;;  %p36_p9 = por %p35_p6, %p34_p1 }
  0x30   : > { %s158_s17 = sand.u32 1, %s1268_s14   ;;  %s909_s22 = sshll.u32 %s1272_s15, 6 }
  0x31   : > { %s1581_s10 = scalar_select %p1398_p3, 1, 0 }
  0x32   : > { %s908_s21 = sshll.u32 %s158_s17, 2  ;;  %s1411_s25 = scalar_lea.hbm %s1568_s0, %s909_s22 }
  0x33   : > { %s162_s26 = scalar_lea.vmem [#allocation2], %s908_s21  ;;  %p1413_p11 = pnand %p1048_p7, %p36_p9 }
  0x34   : > { %s169_s27 = sshll.u32 %s162_s26, 4  ;;  %s159_s29 = scalar_lea.sflag [#allocation3], %s158_s17  ;;  %s170_s27 = int_to_ptr.vmem [resolvable:$true] %s169_s27 }
  0x35   : > { %s1176_s30 = scalar_lea.hbm %s1411_s25, 64  ;;  %p1178_p0 = pneg %p1413_p11 }
  0x36   : > { %p1177_p13 = scmp.ne.s32.totalorder %s1411_s25, %s1176_s30  ;;  %s1181_s6 = scalar_lea.hbm %s1568_s0, 128 }
  0x37   : > { %p1182_p1 = scmp.lt.s32.totalorder %s1411_s25, %s1568_s0  ;;  %p1183_p2 = scmp.lt.s32.totalorder %s1181_s6, %s1176_s30 }
  0x38   : > { %p1179_p5 = pnand %p1178_p0, %p1177_p13 }
  0x39   : > { %p1184_p6 = por %p1183_p2, %p1182_p1 }
  0x3a   : > { %p1180_p10 = pneg %p1179_p5 }
  0x3c   : > { %p1185_p12 = pnand %p1184_p6, %p1180_p10 }
  0x3e   : > { %1188 = shalt.err (!%p1185_p12)
}
  0x3f   : > { %s1189_s21 = scalar_lea.vmem %s170_s27, 64  ;;  %s1278_s17 = smov [#allocation2]  }
  0x40   : > { %p1190_p7 = scmp.ne.s32.totalorder %s170_s27, %s1189_s21  ;;  %s1194_s22 = sshll.u32 %s1278_s17, 4  ;;  %s1195_s22 = int_to_ptr.vmem [resolvable:$false] %s1194_s22 }
  0x41   : > { %s1196_s23 = scalar_lea.vmem %s1195_s22, 128  ;;  %p1197_p13 = scmp.lt.s32.totalorder %s170_s27, %s1195_s22 }
  0x42   : > { %p1192_p9 = pnand %p1190_p7, %p1178_p0  ;;  %p1198_p5 = scmp.lt.s32.totalorder %s1196_s23, %s1189_s21 }
  0x44   : > { %p1193_p3 = pneg %p1192_p9  ;;  %p1199_p4 = por %p1198_p5, %p1197_p13 }
  0x46   : > { %p1200_p8 = pnand %p1199_p4, %p1193_p3 }
  0x48   : > { %1203 = shalt.err (!%p1200_p8)
}
  0x49   : > { %1041 = dma.hbm_to_vmem [thread:$0]  (!%p1413_p11), %s1411_s25, 64, %s170_s27, %s159_s29  }
  0x4a   : > { %p1583_p10 = scmp.ne.s32.totalorder %s1578_s20, 0 }
  0x4b   : > { %s1434_s24 = sand.u32 (!%p1583_p10), 1, %s1264_s13   ;;  %p1584_p0 = scmp.ne.s32.totalorder (!%p1583_p10), %s1576_s18, 0 }
  0x4c   : > { %178 = sbr.rel (%p1583_p10) target bundleno = 1340 (0x53c), region = 32  ;;  %s911_s26 = sshll.u32 (!%p1583_p10), %s1434_s24, 2 }
  0x4d   : > { %s181_s30 = scalar_lea.sflag (!%p1583_p10), [#allocation3], %s1434_s24  ;;  %s184_s4 = scalar_lea.vmem (!%p1583_p10), [#allocation2], %s911_s26 }
  0x51   : > { %1247 = dma.done.wait (%p1584_p0), %s181_s30, 64  }
  0x52   : > { %1249 = vsyncadd (%p1584_p0), %s181_s30, 4294967232  ;;  %p1585_p4 = scmp.eq.s32.totalorder %s1337_s16, 0 }
  0x54   : > { %1251 = dma.done.wait (%p1585_p4), [#allocation6], 512   ;;  %p1586_p8 = pmov %p1585_p4 }
  0x55   : > { %v1279_v0 = vmov 0.0   ;;  %vm1280_vm0 = vmmov 0   ;;  %v1104_v1 = vld [vmem:[#allocation5 + $0x8] sm:$0xff]   ;;  %v1105_v2 = vld [vmem:[#allocation5] sm:$0xff]   ;;  %v216_v3 = vld [vmem:[%s184_s4] sm:$0xf] }
  0x56   : > { %1253 = vsyncadd (%p1586_p8), [#allocation6], 4294966784  ;;  %955 = vmatprep.subr.bf16.mxu0 %v1279_v0  ;;  %959 = vmatprep.mubr.msk.bf16.mxu0 %vm1280_vm0, %v1279_v0  ;;  %vm233_vm1 = vcmask 261120   ;;  %s1281_s18 = smov 120   ;;  %s1282_s20 = smov 96   ;;  %vm281_vm2 = vcmask 64512  }
  0x57   : > { %963 = vmatprep.subr.bf16.mxu1 %v1279_v0  ;;  %965 = vmatprep.mubr.msk.bf16.mxu1 %vm1280_vm0, %v1279_v0  ;;  %s1283_s25 = smov 80   ;;  %s1284_s27 = smov 88   ;;  %vm343_vm3 = vcmask 1043456   ;;  %vm735_vm4 = vcmask 130048   ;;  %vm738_vm5 = vcmask 195584  }
  0x58   : > { %956 = vmatpush3.bf16.msra.mxu0 %v1104_v1  ;;  %s1285_s28 = smov 72   ;;  %s1286_s29 = smov 112  }
  0x59   : > { %957 = vmatprep.subr.bf16.mxu0 %v1279_v0  ;;  %s1287_s5 = smov 104   ;;  %s1288_s6 = smov 56  }
  0x5a   : > { %s1289_s8 = smov 64   ;;  %s1290_s9 = smov 40  }
  0x5b   : > { %s1291_s21 = smov 48   ;;  %s1292_s17 = smov 8  }
  0x5c   : > { %958 = vmatpush3.bf16.msra.mxu0 %v1105_v2  ;;  %s1293_s22 = smov 16   ;;  %s1294_s23 = smov 24  }
  0x5d   : > { %969 = vmatprep.subr.bf16.mxu0 %v1279_v0  ;;  %s914_s26 = sshll.u32 %s1434_s24, 3  ;;  %s930_s30 = sshll.u32 %s1337_s16, 7 }
  0x5e   : > { %s214_s4 = scalar_lea.vmem [#allocation8], %s914_s26  ;;  %p1587_p11 = scmp.ne.s32.totalorder %s1581_s10, 0 }
  0x5f   : > { %960 = vmatmul.mubr.msk.bf16.vlgmr.msra.gmra.mxu0 %vm233_vm1, %v216_v3  ;;  %s1295_s16 = smov [#allocation8]  }
  0x60   : > { %971 = vmatprep.mubr.msk.bf16.mxu0 %vm1280_vm0, %v1279_v0 }
 0x11f   : > { %v271_v4 = vpop.f32.mrf.mxu0 }
 0x120   : > { %v1457_v5 = vpack.c.bf16 %v271_v4, %v271_v4 }
 0x121   : > { %v961_v6 = vpop.f32.mrf.mxu0 }
 0x122   : > { %390 = vrot.lane.b32.xlu1 %v1457_v5, %s1281_s18  ;;  %279 = vrot.lane.b32.xlu0 %v1457_v5, %s1282_s20  ;;  %s814_s18 = sshll.u32 %s214_s4, 4  ;;  %s1526_s18 = int_to_ptr.vmem [resolvable:$true] %s814_s18 }
 0x123   : > { %v274_v7 = vpop.f32.mrf.mxu0 }
 0x125   : > { %v962_v8 = vpop.f32.mrf.mxu0 }
 0x126   : > { %503 = vrot.lane.b32.xlu1 %v1457_v5, %s1283_s25  ;;  %392 = vrot.lane.b32.xlu0 %v1457_v5, %s1284_s27  ;;  %s1524_s27 = scalar_lea.hbm %s1571_s3, %s930_s30 }
 0x12a   : > { %614 = vrot.lane.b32.xlu1 %v1457_v5, %s1285_s28  ;;  %501 = vrot.lane.b32.xlu0 %v1457_v5, %s1286_s29  ;;  %s801_s28 = scalar_lea.sflag [#allocation4], %s1434_s24  ;;  %s1204_s29 = scalar_lea.vmem %s1526_s18, 128 }
 0x12b   : > { %p1205_p3 = scmp.ne.s32.totalorder %s1526_s18, %s1204_s29 }
 0x12d   : > { %p1206_p1 = pnand %p1205_p3, %p1587_p11 }
 0x12e   : > { %612 = vrot.lane.b32.xlu0 %v1457_v5, %s1287_s5  ;;  %s1208_s5 = sshll.u32 %s1295_s16, 4  ;;  %s1209_s5 = int_to_ptr.vmem [resolvable:$false] %s1208_s5 }
 0x12f   : > { %p1207_p2 = pneg %p1206_p1  ;;  %p1211_p6 = scmp.lt.s32.totalorder %s1526_s18, %s1209_s5 }
 0x194   : > { %v280_v9 = vpop.permute.xlu0 %279  ;;  %v391_v12 = vpop.permute.xlu1 %390 }
 0x195   : > { %v286_v10 = vsel %vm281_vm2, %v280_v9, 0 }
 0x196   : > { %964 = vmatpush3.bf16.xpose.msra.mxu1 %v286_v10 }
 0x197   : > { %975 = vmatprep.subr.bf16.mxu1 %v1279_v0 }
 0x198   : > { %v393_v11 = vpop.permute.xlu0 %392  ;;  %v504_v14 = vpop.permute.xlu1 %503 }
 0x199   : > { %v398_v13 = vsel %vm281_vm2, %v393_v11, 0  ;;  %v509_v15 = vsel %vm281_vm2, %v504_v14, 0 }
 0x19c   : > { %v615_v16 = vpop.permute.xlu1 %614  ;;  %v502_v17 = vpop.permute.xlu0 %501 }
 0x19d   : > { %966 = vmatmul.mubr.msk.bf16.vlgmr.msra.gmra.mxu1 %vm281_vm2, %v1457_v5  ;;  %v620_v18 = vsel %vm281_vm2, %v615_v16, 0 }
 0x19e   : > { %976 = vmatpush3.bf16.xpose.msra.mxu1 %v398_v13  ;;  %977 = vmatprep.mubr.msk.bf16.mxu1 %vm1280_vm0, %v1279_v0 }
 0x19f   : > { %987 = vmatprep.subr.bf16.mxu1 %v1279_v0 }
 0x1a0   : > { %v613_v19 = vpop.permute.xlu0 %612 }
 0x1a5   : > { %978 = vmatmul.mubr.msk.bf16.vlgmr.msra.gmra.mxu1 %vm281_vm2, %v391_v12 }
 0x1a6   : > { %988 = vmatpush3.bf16.xpose.msra.mxu1 %v509_v15  ;;  %989 = vmatprep.mubr.msk.bf16.mxu1 %vm1280_vm0, %v1279_v0 }
 0x1a7   : > { %999 = vmatprep.subr.bf16.mxu1 %v1279_v0 }
 0x1ad   : > { %990 = vmatmul.mubr.msk.bf16.vlgmr.msra.gmra.mxu1 %vm281_vm2, %v502_v17 }
 0x1ae   : > { %1000 = vmatpush3.bf16.xpose.msra.mxu1 %v620_v18  ;;  %1001 = vmatprep.mubr.msk.bf16.mxu1 %vm1280_vm0, %v1279_v0 }
 0x1af   : > { %1011 = vmatprep.subr.bf16.mxu1 %v1279_v0 }
 0x1b5   : > { %1002 = vmatmul.mubr.msk.bf16.vlgmr.msra.gmra.mxu1 %vm281_vm2, %v613_v19 }
 0x1b6   : > { %1015 = vmatprep.mubr.msk.bf16.mxu1 %vm1280_vm0, %v1279_v0 }
 0x25d   : > { %v322_v20 = vpop.f32.mrf.mxu1 }
 0x25e   : > { %v328_v21 = vsel %vm281_vm2, %v322_v20, -inf }
 0x25f   : > { %329 = vmax.xlane.f32.xlu1 %v328_v21  ;;  %v967_v22 = vpop.f32.mrf.mxu1 }
 0x260   : > { %v1106_v22 = vld [vmem:[#allocation7 + $0x8] sm:$0xff]  }
 0x261   : > { %v325_v23 = vpop.f32.mrf.mxu1  ;;  %1012 = vmatpush3.bf16.msra.mxu1 %v1106_v22 }
 0x262   : > { %v1107_v23 = vld [vmem:[#allocation7] sm:$0xff]   ;;  %1013 = vmatprep.subr.bf16.mxu1 %v1279_v0 }
 0x263   : > { %v968_v24 = vpop.f32.mrf.mxu1 }
 0x265   : > { %v434_v25 = vpop.f32.mrf.mxu1  ;;  %1014 = vmatpush3.bf16.msra.mxu1 %v1107_v23 }
 0x266   : > { %v440_v26 = vsel %vm281_vm2, %v434_v25, -inf }
 0x267   : > { %441 = vmax.xlane.f32.xlu0 %v440_v26  ;;  %v979_v27 = vpop.f32.mrf.mxu1 }
 0x269   : > { %v437_v28 = vpop.f32.mrf.mxu1 }
 0x26b   : > { %v980_v29 = vpop.f32.mrf.mxu1 }
 0x26d   : > { %v545_v30 = vpop.f32.mrf.mxu1 }
 0x26e   : > { %v551_v31 = vsel %vm281_vm2, %v545_v30, -inf }
 0x26f   : > { %552 = vmax.xlane.f32.xlu0 %v551_v31  ;;  %v991_v32 = vpop.f32.mrf.mxu1 }
 0x270   : > { %450 = vrot.lane.b32.xlu1 %v1457_v5, %s1288_s6  ;;  %s1210_s6 = scalar_lea.vmem %s1209_s5, 256 }
 0x271   : > { %v548_v33 = vpop.f32.mrf.mxu1  ;;  %p1212_p12 = scmp.lt.s32.totalorder %s1210_s6, %s1204_s29 }
 0x273   : > { %v992_v34 = vpop.f32.mrf.mxu1  ;;  %p1213_p7 = por %p1212_p12, %p1211_p6 }
 0x275   : > { %v656_v35 = vpop.f32.mrf.mxu1  ;;  %p1214_p9 = pnand %p1213_p7, %p1207_p2 }
 0x276   : > { %v662_v39 = vsel %vm281_vm2, %v656_v35, -inf }
 0x277   : > { %v1003_v36 = vpop.f32.mrf.mxu1 }
 0x279   : > { %v659_v37 = vpop.f32.mrf.mxu1 }
 0x27b   : > { %v1004_v38 = vpop.f32.mrf.mxu1 }
 0x285   : > { %338 = vrot.lane.b32.xlu0 %v1457_v5, %s1289_s8 }
 0x289   : > { %672 = vrot.lane.b32.xlu0 %v1457_v5, %s1290_s9 }
 0x294   : > { %663 = vmax.xlane.f32.xlu1 %v662_v39 }
 0x2a5   : > { %561 = vrot.lane.b32.xlu1 %v1457_v5, %s1291_s21 }
 0x2e8   : > { %v330_v40 = vpop.xlane.xlu1 %329 }
 0x2e9   : > { %v331_v41 = vsub.f32 %v322_v20, %v330_v40 }
 0x2eb   : > { %v332_v42 = vmul.f32 1.442695, %v331_v41 }
 0x2ec   : > { %v451_v52 = vpop.permute.xlu1 %450 }
 0x2ed   : > { %1108 = vpow2.f32 %v332_v42  ;;  %v456_v54 = vsel %vm343_vm3, %v451_v52, 0 }
 0x2f0   : > { %v442_v43 = vpop.xlane.xlu0 %441 }
 0x2f1   : > { %v443_v44 = vsub.f32 %v434_v25, %v442_v43 }
 0x2f3   : > { %v444_v45 = vmul.f32 1.442695, %v443_v44 }
 0x2f5   : > { %1110 = vpow2.f32 %v444_v45 }
 0x2f8   : > { %v553_v46 = vpop.xlane.xlu0 %552 }
 0x2f9   : > { %v554_v47 = vsub.f32 %v545_v30, %v553_v46 }
 0x2fa   : > { %v1109_v49 = vpop.eup %1108 }
 0x2fb   : > { %v555_v48 = vmul.f32 1.442695, %v554_v47  ;;  %v337_v53 = vpack.c.bf16 %v1109_v49, %v1109_v49  ;;  %v334_v57 = vsel %vm281_vm2, %v1109_v49, 0.0 }
 0x2fc   : > { %v339_v50 = vpop.permute.xlu0 %338 }
 0x2fd   : > { %1112 = vpow2.f32 %v555_v48  ;;  %v345_v51 = vsel %vm343_vm3, %v339_v50, 0 }
 0x2fe   : > { %970 = vmatpush3.bf16.msra.mxu0 %v345_v51 }
 0x2ff   : > { %981 = vmatprep.subr.bf16.mxu0 %v1279_v0 }
 0x300   : > { %v673_v3 = vpop.permute.xlu0 %672 }
 0x301   : > { %972 = vmatmul.mubr.msk.bf16.vlgmr.msra.gmra.mxu0 %vm281_vm2, %v337_v53  ;;  %v678_v5 = vsel %vm343_vm3, %v673_v3, 0 }
 0x302   : > { %v1111_v55 = vpop.eup %1110  ;;  %982 = vmatpush3.bf16.msra.mxu0 %v456_v54  ;;  %983 = vmatprep.mubr.msk.bf16.mxu0 %vm1280_vm0, %v1279_v0 }
 0x303   : > { %v446_v56 = vsel %vm281_vm2, %v1111_v55, 0.0  ;;  %993 = vmatprep.subr.bf16.mxu0 %v1279_v0  ;;  %v449_v58 = vpack.c.bf16 %v1111_v55, %v1111_v55 }
 0x304   : > { %447 = vadd.xlane.f32.xlu1 %v446_v56 }
 0x308   : > { %335 = vadd.xlane.f32.xlu1 %v334_v57 }
 0x309   : > { %984 = vmatmul.mubr.msk.bf16.vlgmr.msra.gmra.mxu0 %vm281_vm2, %v449_v58 }
 0x30a   : > { %v1113_v59 = vpop.eup %1112  ;;  %995 = vmatprep.mubr.msk.bf16.mxu0 %vm1280_vm0, %v1279_v0 }
 0x30b   : > { %v557_v60 = vsel %vm281_vm2, %v1113_v59, 0.0  ;;  %v560_v4 = vpack.c.bf16 %v1113_v59, %v1113_v59 }
 0x30c   : > { %558 = vadd.xlane.f32.xlu0 %v557_v60 }
 0x31d   : > { %v664_v61 = vpop.xlane.xlu1 %663 }
 0x31e   : > { %v665_v62 = vsub.f32 %v656_v35, %v664_v61 }
 0x320   : > { %v666_v63 = vmul.f32 1.442695, %v665_v62 }
 0x321   : > { %v562_v1 = vpop.permute.xlu1 %561 }
 0x322   : > { %1114 = vpow2.f32 %v666_v63  ;;  %v567_v2 = vsel %vm343_vm3, %v562_v1, 0 }
 0x323   : > { %994 = vmatpush3.bf16.msra.mxu0 %v567_v2 }
 0x324   : > { %1005 = vmatprep.subr.bf16.mxu0 %v1279_v0 }
 0x326   : > { %996 = vmatmul.mubr.msk.bf16.vlgmr.msra.gmra.mxu0 %vm281_vm2, %v560_v4 }
 0x327   : > { %1006 = vmatpush3.bf16.msra.mxu0 %v678_v5  ;;  %1007 = vmatprep.mubr.msk.bf16.mxu0 %vm1280_vm0, %v1279_v0 }
 0x32f   : > { %v1115_v6 = vpop.eup %1114 }
 0x330   : > { %v668_v7 = vsel %vm281_vm2, %v1115_v6, 0.0  ;;  %v671_v8 = vpack.c.bf16 %v1115_v6, %v1115_v6 }
 0x331   : > { %669 = vadd.xlane.f32.xlu0 %v668_v7 }
 0x332   : > { %1008 = vmatmul.mubr.msk.bf16.vlgmr.msra.gmra.mxu0 %vm281_vm2, %v671_v8 }
 0x38d   : > { %v448_v9 = vpop.xlane.xlu1 %447 }
 0x38e   : > { %1116 = vrcp.f32 %v448_v9 }
 0x391   : > { %v336_v38 = vpop.xlane.xlu1 %335 }
 0x395   : > { %v559_v21 = vpop.xlane.xlu0 %558 }
 0x396   : > { %1118 = vrcp.f32 %v559_v21 }
 0x39b   : > { %v1117_v14 = vpop.eup %1116 }
 0x3a3   : > { %v1119_v25 = vpop.eup %1118 }
 0x3ba   : > { %v670_v24 = vpop.xlane.xlu0 %669 }
 0x3bb   : > { %1120 = vrcp.f32 %v670_v24 }
 0x3bc   : > { %1122 = vrcp.f32 %v336_v38 }
 0x3c1   : > { %v381_v10 = vpop.f32.mrf.mxu0 }
 0x3c3   : > { %v973_v11 = vpop.f32.mrf.mxu0 }
 0x3c5   : > { %v384_v12 = vpop.f32.mrf.mxu0 }
 0x3c7   : > { %v974_v13 = vpop.f32.mrf.mxu0 }
 0x3c8   : > { %v1121_v32 = vpop.eup %1120 }
 0x3c9   : > { %v492_v15 = vpop.f32.mrf.mxu0  ;;  %v1123_v39 = vpop.eup %1122 }
 0x3ca   : > { %v499_v16 = vmul.f32 %v1117_v14, %v492_v15  ;;  %v388_v40 = vmul.f32 %v1123_v39, %v381_v10 }
 0x3cb   : > { %v985_v17 = vpop.f32.mrf.mxu0 }
 0x3cc   : > { %v500_v18 = vpack.c.bf16 %v499_v16, %v499_v16  ;;  %v389_v43 = vpack.c.bf16 %v388_v40, %v388_v40 }
 0x3cd   : > { %v495_v19 = vpop.f32.mrf.mxu0 }
 0x3ce   : > { %724 = vrot.lane.b32.xlu0 %v500_v18, %s1292_s17 }
 0x3cf   : > { %v986_v20 = vpop.f32.mrf.mxu0 }
 0x3e6   : > { %v603_v26 = vpop.f32.mrf.mxu0 }
 0x3e7   : > { %v610_v27 = vmul.f32 %v1119_v25, %v603_v26 }
 0x3e8   : > { %v997_v28 = vpop.f32.mrf.mxu0 }
 0x3e9   : > { %v611_v29 = vpack.c.bf16 %v610_v27, %v610_v27 }
 0x3ea   : > { %v606_v30 = vpop.f32.mrf.mxu0 }
 0x3eb   : > { %727 = vrot.lane.b32.xlu1 %v611_v29, %s1293_s22 }
 0x3ec   : > { %v998_v31 = vpop.f32.mrf.mxu0 }
 0x3f2   : > { %v714_v33 = vpop.f32.mrf.mxu0 }
 0x3f3   : > { %v721_v34 = vmul.f32 %v1121_v32, %v714_v33 }
 0x3f4   : > { %v1009_v35 = vpop.f32.mrf.mxu0 }
 0x3f5   : > { %v722_v36 = vpack.c.bf16 %v721_v34, %v721_v34 }
 0x3f6   : > { %v717_v37 = vpop.f32.mrf.mxu0 }
 0x3f7   : > { %730 = vrot.lane.b32.xlu1 %v722_v36, %s1294_s23 }
 0x3f8   : > { %v1010_v0 = vpop.f32.mrf.mxu0 }
 0x440   : > { %v725_v41 = vpop.permute.xlu0 %724 }
 0x441   : > { %v734_v44 = vsel %vm281_vm2, %v389_v43, %v725_v41 }
 0x45d   : > { %v728_v42 = vpop.permute.xlu1 %727 }
 0x45e   : > { %v737_v45 = vsel %vm735_vm4, %v734_v44, %v728_v42 }
 0x469   : > { %v731_v46 = vpop.permute.xlu1 %730 }
 0x46a   : > { %v740_v47 = vsel %vm738_vm5, %v737_v45, %v731_v46 }
 0x46b   : > { %1016 = vmatmul.mubr.msk.bf16.vlgmr.msra.gmra.mxu1 %vm233_vm1, %v740_v47 }
 0x52b   : > { %v793_v48 = vpop.f32.mrf.mxu1 }
 0x52c   : > { %799 = vst.msk [vmem:[%s214_s4] sm:$0xff] %vm233_vm1, %v793_v48 }
 0x52d   : > { %v1017_v49 = vpop.f32.mrf.mxu1 }
 0x52e   : > { %1217 = shalt.err (!%p1214_p9)
}
 0x52f   : > { %s1218_s8 = scalar_lea.hbm %s1524_s27, 128  ;;  %s1222_s21 = scalar_lea.hbm %s1571_s3, 256 }
 0x530   : > { %p1219_p13 = scmp.ne.s32.totalorder %s1524_s27, %s1218_s8  ;;  %p1223_p0 = scmp.lt.s32.totalorder %s1524_s27, %s1571_s3 }
 0x531   : > { %p1224_p4 = scmp.lt.s32.totalorder %s1222_s21, %s1218_s8 }
 0x532   : > { %p1220_p5 = pnand %p1219_p13, %p1587_p11 }
 0x533   : > { %p1225_p8 = por %p1224_p4, %p1223_p0 }
 0x534   : > { %p1221_p10 = pneg %p1220_p5 }
 0x536   : > { %p1226_p3 = pnand %p1225_p8, %p1221_p10 }
 0x538   : > { %1229 = shalt.err (!%p1226_p3)
}
 0x539   : > { %1029 = dma.vmem_to_hbm [thread:$0]  (%p1587_p11), %s1526_s18, 128, %s1524_s27, %s801_s28   ;;  %v796_v50 = vpop.f32.mrf.mxu1 }
 0x53b   : > { %v1018_v51 = vpop.f32.mrf.mxu1 }
 0x53c PF: > { %s826_s23 = sand.u32 1, %s1260_s12   ;;  %p1588_p1 = scmp.ne.s32.totalorder %s1577_s19, 0 }
 0x53d   : > { %p1589_p2 = scmp.ge.s32.totalorder %s1272_s15, 2  ;;  %s827_s26 = scalar_lea.sflag [#allocation4], %s826_s23 }
 0x53f   : > { %p1043_p6 = pnand %p1589_p2, %p1588_p1 }
 0x541   : > { %p1044_p12 = pneg %p1043_p6 }
 0x543   : > { %1255 = dma.done.wait (%p1044_p12), %s827_s26, 128  }
 0x544   : > { %1257 = vsyncadd (%p1044_p12), %s827_s26, 4294967168  ;;  %p17_p11 = scmp.ge.s32.totalorder %s1388_s7, 4   ;;  %s1590_s12 = smov %s1264_s13 }
 0x545   : > { %s1591_s13 = smov %s1268_s14  ;;  %s1592_s14 = smov %s1404_s11 }
 0x546   : > { %s1593_s15 = smov %s1388_s7  ;;  %19 = sbr.rel (!%p17_p11) target bundleno = 6 (0x6), region = 85 }
 0x54b   :  { %832 = vsyncpa [#allocation3], 1 }
 0x54c   :  { %834 = vsyncpa [#allocation3 + $0x1], 1 }
 0x54d   :  { %835 = vsyncpa [#allocation6], 1 }
 0x54e   :  { %836 = vsyncpa [#allocation4], 1 }
 0x54f   :  { %838 = vsyncpa [#allocation4 + $0x1], 1 }

</bundles_post_ra>
